<compile_context>
chip_gen: v7x
topology: tpu7x:2x2x1
jax: 0.10.0
libtpu: 0.0.40
codegen_flags: <defaults>
</compile_context>

<pallas_src>
import jax
import jax.numpy as jnp
from jax.experimental import pallas as pl
from jax.experimental.pallas import tpu as pltpu

D_IN = 784          # MNIST 28*28, multiple of 8 -> fine as MXU K dim, no padding
LANE = 128          # pad hidden/output feature dims to full vreg lane width


def _round_up(n, m):
    return ((n + m - 1) // m) * m


def mlp_kernel(x_ref, w1_ref, w2_ref, w3_ref, o_ref):
    # x arrives as f32 straight from HBM; cast to bf16 just before the MXU.
    x = x_ref[...].astype(jnp.bfloat16)
    # Layer 1: (bm, 784) bf16 @ (784, 128) bf16 -> f32 accum, ReLU in f32.
    h1 = jnp.dot(x, w1_ref[...], preferred_element_type=jnp.float32)
    h1 = jnp.maximum(h1, 0.0)
    # Layer 2.
    h2 = jnp.dot(h1.astype(jnp.bfloat16), w2_ref[...],
                 preferred_element_type=jnp.float32)
    h2 = jnp.maximum(h2, 0.0)
    # Output layer: no activation; store bf16 (lane-dense, unmasked vst).
    y = jnp.dot(h2.astype(jnp.bfloat16), w3_ref[...],
                preferred_element_type=jnp.float32)
    o_ref[...] = y.astype(o_ref.dtype)


def prepare_params(W1, W2, W3):
    """One-time prep: PyTorch (out, in) f32 weights -> (in, out) lane-padded bf16."""
    h_pad = _round_up(W1.shape[0], LANE)   # hidden width, padded to 128 lanes
    o_pad = _round_up(W3.shape[0], LANE)   # output width, padded to 128 lanes

    def pad2(a, rows, cols):
        return jnp.pad(a, ((0, rows - a.shape[0]),
                           (0, cols - a.shape[1]))).astype(jnp.bfloat16)

    w1p = pad2(W1.T, D_IN, h_pad)          # (784, 128)
    w2p = pad2(W2.T, h_pad, h_pad)         # (128, 128)
    w3p = pad2(W3.T, h_pad, o_pad)         # (128, 128)
    return w1p, w2p, w3p


def mlp_forward(x, w1p, w2p, w3p, n_outputs, *, block_b=2048):
    """x: (B, 784) f32; padded bf16 weights from prepare_params -> (B, n_outputs) f32."""
    B, D = x.shape
    assert D == w1p.shape[0] == D_IN
    o_pad = w3p.shape[1]

    # Pad the batch only to a multiple of 8 (block second-to-last-dim rule), and
    # only when actually needed -- never to a full multiple of the tile.
    b_pad = _round_up(B, 8)
    if b_pad != B:
        x = jnp.pad(x, ((0, b_pad - B), (0, 0)))

    # Batch tile: multiple of 8, capped by the batch itself.
    bm = _round_up(min(block_b, b_pad), 8)
    # v7x has 2 TensorCores: when the batch is large, keep >= 2 grid steps on the
    # "parallel" axis so both cores get work.
    if b_pad >= 1024 and pl.cdiv(b_pad, bm) < 2:
        bm = _round_up(pl.cdiv(b_pad, 2), 8)
    grid = pl.cdiv(b_pad, bm)              # partial last block is fine

    out = pl.pallas_call(
        mlp_kernel,
        out_shape=jax.ShapeDtypeStruct((b_pad, o_pad), jnp.bfloat16),
        grid_spec=pltpu.PrefetchScalarGridSpec(
            num_scalar_prefetch=0,
            grid=(grid,),
            in_specs=[
                # f32 x tiles stream (last dim == full array dim 784 -> legal).
                pl.BlockSpec((bm, D_IN), lambda i: (i, 0)),
                # Weights: constant index_map -> DMA'd once, VMEM-resident.
                pl.BlockSpec(w1p.shape, lambda i: (0, 0)),
                pl.BlockSpec(w2p.shape, lambda i: (0, 0)),
                pl.BlockSpec(w3p.shape, lambda i: (0, 0)),
            ],
            out_specs=pl.BlockSpec((bm, o_pad), lambda i: (i, 0)),
        ),
        compiler_params=pltpu.CompilerParams(
            dimension_semantics=("parallel",),  # pipeline + shard across v7x TCs
            vmem_limit_bytes=32 << 20,          # covers v5e's 16 MiB default scope
        ),
    )(x, w1p, w2p, w3p)

    # Slice away batch pad + lane pad; upcast once for downstream f32 consumers.
    return out[:B, :n_outputs].astype(jnp.float32)


if __name__ == "__main__":
    # Small, deterministic setup consistent with MLPNet(n_hidden=32, n_outputs=10).
    B, H, O = 8, 32, 10

    key = jax.random.PRNGKey(0)
    kx, k1, k2, k3 = jax.random.split(key, 4)

    x = jax.random.normal(kx, (B, D_IN), dtype=jnp.float32)

    # PyTorch Linear weights are (out, in); init uniform(-1/sqrt(in), 1/sqrt(in)).
    def init_w(k, out_f, in_f):
        bound = 1.0 / jnp.sqrt(jnp.float32(in_f))
        return jax.random.uniform(k, (out_f, in_f), jnp.float32, -bound, bound)

    W1 = init_w(k1, H, D_IN)   # lin1: 784 -> H
    W2 = init_w(k2, H, H)      # lin2: H  -> H
    W3 = init_w(k3, O, H)      # fc1 : H  -> O

    # One-time weight prep (transpose + lane-pad + bf16 cast), reused across calls.
    w1p, w2p, w3p = prepare_params(W1, W2, W3)

    # TODO(synk): self.act activation caching and consolidate()/space projections
    # are training-time bookkeeping, not part of the forward math; not ported.
    y = mlp_forward(x, w1p, w2p, w3p, O)
    y = jax.block_until_ready(y)

    # Pure-JAX f32 reference (same math as the PyTorch forward with space=None).
    h1 = jnp.maximum(x @ W1.T, 0.0)
    h2 = jnp.maximum(h1 @ W2.T, 0.0)
    y_ref = h2 @ W3.T

    assert y.shape == (B, O)
    # bf16 MXU operands / bf16 output store: loosened tolerance vs f32 reference.
    assert jnp.allclose(y, y_ref, atol=5e-2, rtol=5e-2), (
        float(jnp.max(jnp.abs(y - y_ref))))

    print("KERNEL_OK")
</pallas_src>

<mosaic_0001>
module attributes {stable_mosaic.version = 11 : i64} {
  func.func @mlp_kernel(%arg0: i32, %arg1: memref<8x784xf32, #tpu.memory_space<vmem>>, %arg2: memref<784x128xbf16, #tpu.memory_space<vmem>>, %arg3: memref<128x128xbf16, #tpu.memory_space<vmem>>, %arg4: memref<128x128xbf16, #tpu.memory_space<vmem>>, %arg5: memref<8x128xbf16, #tpu.memory_space<vmem>>) attributes {dimension_semantics = [#tpu.dimension_semantics<parallel>], iteration_bounds = array<i64: 1>, scalar_prefetch = 0 : i64, scratch_operands = 0 : i64, tpu.core_type = #tpu.core_type<tc>, window_params = [{transform_indices = @transform_0, window_bounds = array<i64: 8, 784>}, {pipeline_mode = #tpu.pipeline_mode<synchronous>, transform_indices = @transform_1, window_bounds = array<i64: 784, 128>}, {pipeline_mode = #tpu.pipeline_mode<synchronous>, transform_indices = @transform_2, window_bounds = array<i64: 128, 128>}, {pipeline_mode = #tpu.pipeline_mode<synchronous>, transform_indices = @transform_3, window_bounds = array<i64: 128, 128>}, {transform_indices = @transform_4, window_bounds = array<i64: 8, 128>}]} {
    %c0 = arith.constant 0 : index
    %c0_0 = arith.constant 0 : index
    %0 = vector.load %arg1[%c0, %c0_0] : memref<8x784xf32, #tpu.memory_space<vmem>>, vector<8x784xf32>
    %1 = arith.truncf %0 : vector<8x784xf32> to vector<8x784xbf16>
    %c0_1 = arith.constant 0 : index
    %c0_2 = arith.constant 0 : index
    %2 = vector.load %arg2[%c0_1, %c0_2] : memref<784x128xbf16, #tpu.memory_space<vmem>>, vector<784x128xbf16>
    %cst = arith.constant dense<0.000000e+00> : vector<8x128xf32>
    %3 = tpu.matmul %1, %2, %cst {dimension_numbers = #tpu.dot_dimension_numbers<[1], [0], [0], [1], [0, 0, 1, 1], [], []>} : vector<8x784xbf16>, vector<784x128xbf16>, vector<8x128xf32> -> vector<8x128xf32>
    %cst_3 = arith.constant 0.000000e+00 : f32
    %4 = vector.broadcast %cst_3 : f32 to vector<8x128xf32>
    %5 = arith.maximumf %3, %4 : vector<8x128xf32>
    %6 = arith.truncf %5 : vector<8x128xf32> to vector<8x128xbf16>
    %c0_4 = arith.constant 0 : index
    %c0_5 = arith.constant 0 : index
    %7 = vector.load %arg3[%c0_4, %c0_5] : memref<128x128xbf16, #tpu.memory_space<vmem>>, vector<128x128xbf16>
    %cst_6 = arith.constant dense<0.000000e+00> : vector<8x128xf32>
    %8 = tpu.matmul %6, %7, %cst_6 {dimension_numbers = #tpu.dot_dimension_numbers<[1], [0], [0], [1], [0, 0, 1, 1], [], []>} : vector<8x128xbf16>, vector<128x128xbf16>, vector<8x128xf32> -> vector<8x128xf32>
    %cst_7 = arith.constant 0.000000e+00 : f32
    %9 = vector.broadcast %cst_7 : f32 to vector<8x128xf32>
    %10 = arith.maximumf %8, %9 : vector<8x128xf32>
    %11 = arith.truncf %10 : vector<8x128xf32> to vector<8x128xbf16>
    %c0_8 = arith.constant 0 : index
    %c0_9 = arith.constant 0 : index
    %12 = vector.load %arg4[%c0_8, %c0_9] : memref<128x128xbf16, #tpu.memory_space<vmem>>, vector<128x128xbf16>
    %cst_10 = arith.constant dense<0.000000e+00> : vector<8x128xf32>
    %13 = tpu.matmul %11, %12, %cst_10 {dimension_numbers = #tpu.dot_dimension_numbers<[1], [0], [0], [1], [0, 0, 1, 1], [], []>} : vector<8x128xbf16>, vector<128x128xbf16>, vector<8x128xf32> -> vector<8x128xf32>
    %14 = arith.truncf %13 : vector<8x128xf32> to vector<8x128xbf16>
    %c0_11 = arith.constant 0 : index
    %c0_12 = arith.constant 0 : index
    %15 = vector.load %arg5[%c0_11, %c0_12] : memref<8x128xbf16, #tpu.memory_space<vmem>>, vector<8x128xbf16>
    tpu.vector_store %arg5[%c0_11, %c0_12], %14 {strides = array<i32>} : memref<8x128xbf16, #tpu.memory_space<vmem>>, vector<8x128xbf16>,
    return
  }
  func.func @transform_0(%arg0: i32) -> (i32, i32) {
    %c0_i32 = arith.constant 0 : i32
    %c0_i32_0 = arith.constant 0 : i32
    return %arg0, %c0_i32 : i32, i32
  }
  func.func @transform_1(%arg0: i32) -> (i32, i32) {
    %c0_i32 = arith.constant 0 : i32
    %c0_i32_0 = arith.constant 0 : i32
    %c0_i32_1 = arith.constant 0 : i32
    return %c0_i32, %c0_i32_0 : i32, i32
  }
  func.func @transform_2(%arg0: i32) -> (i32, i32) {
    %c0_i32 = arith.constant 0 : i32
    %c0_i32_0 = arith.constant 0 : i32
    %c0_i32_1 = arith.constant 0 : i32
    return %c0_i32, %c0_i32_0 : i32, i32
  }
  func.func @transform_3(%arg0: i32) -> (i32, i32) {
    %c0_i32 = arith.constant 0 : i32
    %c0_i32_0 = arith.constant 0 : i32
    %c0_i32_1 = arith.constant 0 : i32
    return %c0_i32, %c0_i32_0 : i32, i32
  }
  func.func @transform_4(%arg0: i32) -> (i32, i32) {
    %c0_i32 = arith.constant 0 : i32
    %c0_i32_0 = arith.constant 0 : i32
    return %arg0, %c0_i32 : i32, i32
  }
}

</mosaic_0001>

<bundles_post_ra>
// kernel: tpu_custom_call.1
= control target key start
LH: loop header
LB: loop body
LE: loop exit
PB: predicated region body
PF: predicated region fallthrough
CT: control target
= control target key end

     0   :  { %9 = vsyncpa [#allocation3], 0  ;;  %s1389_s0 = inlined_call_operand.hbm [shape: f32[8,784], index: 0, kind: input, shape index: {}]   ;;  %s1390_s1 = inlined_call_operand.hbm [shape: bf16[784,128], index: 1, kind: input, shape index: {}]   ;;  %s1391_s2 = inlined_call_operand.hbm [shape: bf16[128,128], index: 2, kind: input, shape index: {}]   ;;  %s1392_s3 = inlined_call_operand.hbm [shape: bf16[128,128], index: 3, kind: input, shape index: {}]   ;;  %s1393_s4 = inlined_call_operand.hbm [shape: bf16[8,128], index: 4, kind: output, shape index: {}]  }
   0x1   :  { %10 = vsyncpa [#allocation6], 0 }
   0x2   :  { %11 = vsyncpa [#allocation9], 0 }
   0x3   :  { %12 = vsyncpa [#allocation4], 0  ;;  %s1263_s15 = smov [#allocation5]   ;;  %s1145_s19 = scalar_lea.hbm %s1390_s1, 6272 }
   0x4   :  { %s28_s16 = sshll.u32 %s1263_s15, 4  ;;  %p1146_p0 = scmp.ne.s32.totalorder %s1390_s1, %s1145_s19  ;;  %s29_s16 = int_to_ptr.vmem [resolvable:$true] %s28_s16 }
   0x5   :  { %p1149_p1 = scmp.lt.u32.totalorder %s1145_s19, %s1390_s1 }
   0x7   :  { %p1151_p2 = pnand %p1149_p1, %p1146_p0 }
   0x9   :  { %1154 = shalt.err (!%p1151_p2)
}
   0xa   :  { %s1155_s24 = scalar_lea.vmem %s29_s16, 6272  ;;  %p1160_p4 = scmp.lt.s32.totalorder %s29_s16, %s29_s16 }
   0xb   :  { %p1156_p3 = scmp.ne.s32.totalorder %s29_s16, %s1155_s24  ;;  %p1161_p5 = scmp.lt.s32.totalorder %s1155_s24, %s1155_s24 }
   0xd   :  { %p1162_p6 = por %p1161_p5, %p1160_p4 }
   0xf   :  { %p1163_p7 = pnand %p1162_p6, %p1156_p3 }
  0x11   :  { %1166 = shalt.err (!%p1163_p7)
}
  0x12   :  { %s1264_s25 = smov 64   ;;  %s1265_s26 = smov 4  }
  0x13   :  { %34 = dma.hbm_to_vmem [thread:$0]  %s1390_s1, 6272, %s29_s16, [#allocation6], %s1264_s25, %s1264_s25, %s1265_s26  }
  0x14   :  { %s1266_s29 = smov [#allocation2]   ;;  %s1267_s5 = smov [#allocation7]  }
  0x15   :  { %s19_s30 = sshll.u32 %s1266_s29, 4  ;;  %s40_s6 = sshll.u32 %s1267_s5, 4  ;;  %s20_s30 = int_to_ptr.vmem [resolvable:$true] %s19_s30  ;;  %s41_s6 = int_to_ptr.vmem [resolvable:$true] %s40_s6 }
  0x16   :  { %s1167_s9 = scalar_lea.hbm %s1389_s0, 896 }
  0x17   :  { %p1168_p8 = scmp.ne.s32.totalorder %s1389_s0, %s1167_s9  ;;  %p1171_p9 = scmp.lt.u32.totalorder %s1167_s9, %s1389_s0 }
  0x19   :  { %p1173_p10 = pnand %p1171_p9, %p1168_p8 }
  0x1b   :  { %1176 = shalt.err (!%p1173_p10)
}
  0x1c   :  { %s1177_s1 = scalar_lea.vmem %s20_s30, 896  ;;  %p1182_p12 = scmp.lt.s32.totalorder %s20_s30, %s20_s30 }
  0x1d   :  { %p1178_p11 = scmp.ne.s32.totalorder %s20_s30, %s1177_s1  ;;  %p1183_p13 = scmp.lt.s32.totalorder %s1177_s1, %s1177_s1 }
  0x1f   :  { %p1184_p0 = por %p1183_p13, %p1182_p12 }
  0x21   :  { %p1185_p1 = pnand %p1184_p0, %p1178_p11 }
  0x23   :  { %1188 = shalt.err (!%p1185_p1)
}
  0x24   :  { %22 = dma.hbm_to_vmem [thread:$0]  %s1389_s0, 896, %s20_s30, [#allocation3]  }
  0x25   :  { %s1189_s18 = scalar_lea.hbm %s1391_s2, 1024 }
  0x26   :  { %p1190_p2 = scmp.ne.s32.totalorder %s1391_s2, %s1189_s18  ;;  %p1193_p3 = scmp.lt.u32.totalorder %s1189_s18, %s1391_s2 }
  0x28   :  { %p1195_p4 = pnand %p1193_p3, %p1190_p2 }
  0x2a   :  { %1198 = shalt.err (!%p1195_p4)
}
  0x2b   :  { %s1199_s23 = scalar_lea.vmem %s41_s6, 1024  ;;  %p1204_p6 = scmp.lt.s32.totalorder %s41_s6, %s41_s6 }
  0x2c   :  { %p1200_p5 = scmp.ne.s32.totalorder %s41_s6, %s1199_s23  ;;  %p1205_p7 = scmp.lt.s32.totalorder %s1199_s23, %s1199_s23 }
  0x2e   :  { %p1206_p8 = por %p1205_p7, %p1204_p6 }
  0x30   :  { %p1207_p9 = pnand %p1206_p8, %p1200_p5 }
  0x32   :  { %1210 = shalt.err (!%p1207_p9)
}
  0x33   :  { %46 = dma.hbm_to_vmem [thread:$0]  %s1391_s2, 1024, %s41_s6, [#allocation6], %s1264_s25, %s1264_s25, %s1265_s26  }
  0x34   :  { %s1268_s27 = smov [#allocation8]   ;;  %s1211_s5 = scalar_lea.hbm %s1392_s3, 1024 }
  0x35   :  { %s52_s28 = sshll.u32 %s1268_s27, 4  ;;  %p1212_p10 = scmp.ne.s32.totalorder %s1392_s3, %s1211_s5  ;;  %s53_s28 = int_to_ptr.vmem [resolvable:$true] %s52_s28 }
  0x36   :  { %p1215_p11 = scmp.lt.u32.totalorder %s1211_s5, %s1392_s3 }
  0x38   :  { %p1217_p12 = pnand %p1215_p11, %p1212_p10 }
  0x3a   :  { %1220 = shalt.err (!%p1217_p12)
}
  0x3b   :  { %s1221_s11 = scalar_lea.vmem %s53_s28, 1024  ;;  %p1226_p0 = scmp.lt.s32.totalorder %s53_s28, %s53_s28 }
  0x3c   :  { %p1222_p13 = scmp.ne.s32.totalorder %s53_s28, %s1221_s11  ;;  %p1227_p1 = scmp.lt.s32.totalorder %s1221_s11, %s1221_s11 }
  0x3e   :  { %p1228_p2 = por %p1227_p1, %p1226_p0 }
  0x40   :  { %p1229_p3 = pnand %p1228_p2, %p1222_p13 }
  0x42   :  { %1232 = shalt.err (!%p1229_p3)
}
  0x43   :  { %58 = dma.hbm_to_vmem [thread:$0]  %s1392_s3, 1024, %s53_s28, [#allocation9], %s1264_s25, %s1264_s25, %s1265_s26  }
  0x44   :  { %1255 = dma.done.wait [#allocation3], 896  }
  0x45   :  { %1256 = vsyncadd [#allocation3], 4294966400 }
  0x46   :  { %1257 = dma.done.wait [#allocation6], 7296  }
  0x47   :  { %1258 = vsyncadd [#allocation6], 4294960000 }
  0x48   :  { %1259 = dma.done.wait [#allocation9], 1024  }
  0x49   :  { %1260 = vsyncadd [#allocation9], 4294966272  ;;  %v1080_v0 = vld [vmem:[#allocation5 + $0x40] sm:$0xff]   ;;  %v1084_v4 = vld [vmem:[#allocation5 + $0x48] sm:$0xff]   ;;  %v1269_v41 = vmov 0.0   ;;  %vm1270_vm0 = vmmov 0  }
  0x4a   :  { %v1081_v1 = vld [vmem:[#allocation5 + $0xc0] sm:$0xff]   ;;  %939 = vmatprep.subr.bf16.mxu0 %v1080_v0  ;;  %v1085_v5 = vld [vmem:[#allocation5 + $0xc8] sm:$0xff]   ;;  %v1088_v8 = vld [vmem:[#allocation5 + $0x50] sm:$0xff]   ;;  %vm478_vm1 = vcmask 130048   ;;  %s1271_s3 = smov [#allocation10]  }
  0x4b   :  { %v1082_v2 = vld [vmem:[#allocation5] sm:$0xff]   ;;  %961 = vmatprep.subr.bf16.mxu1 %v1081_v1  ;;  %v1086_v6 = vld [vmem:[#allocation5 + $0x8] sm:$0xff]   ;;  %v1089_v9 = vld [vmem:[#allocation5 + $0xd0] sm:$0xff]   ;;  %s862_s25 = sshll.u32 %s1271_s3, 4  ;;  %s863_s25 = int_to_ptr.vmem [resolvable:$true] %s862_s25 }
  0x4c   :  { %v1083_v3 = vld [vmem:[#allocation5 + $0x80] sm:$0xff]   ;;  %940 = vmatpush3.bf16.msra.mxu0 %v1082_v2  ;;  %v1087_v7 = vld [vmem:[#allocation5 + $0x88] sm:$0xff]   ;;  %v1090_v10 = vld [vmem:[#allocation5 + $0x10] sm:$0xff]   ;;  %s1233_s26 = scalar_lea.vmem %s863_s25, 64  ;;  %p1238_p5 = scmp.lt.s32.totalorder %s863_s25, %s863_s25 }
  0x4d   :  { %962 = vmatpush3.bf16.msra.mxu1 %v1083_v3  ;;  %941 = vmatprep.subr.bf16.mxu0 %v1084_v4  ;;  %v1091_v11 = vld [vmem:[#allocation5 + $0x90] sm:$0xff]   ;;  %v1092_v12 = vld [vmem:[#allocation5 + $0x58] sm:$0xff]   ;;  %v1096_v16 = vld [vmem:[#allocation5 + $0x60] sm:$0xff]   ;;  %p1234_p4 = scmp.ne.s32.totalorder %s863_s25, %s1233_s26  ;;  %p1239_p6 = scmp.lt.s32.totalorder %s1233_s26, %s1233_s26 }
  0x4e   :  { %963 = vmatprep.subr.bf16.mxu1 %v1085_v5  ;;  %v1093_v13 = vld [vmem:[#allocation5 + $0xd8] sm:$0xff]   ;;  %v1097_v17 = vld [vmem:[#allocation5 + $0xe0] sm:$0xff]   ;;  %v1100_v20 = vld [vmem:[#allocation5 + $0x68] sm:$0xff]  }
  0x4f   :  { %v1094_v14 = vld [vmem:[#allocation5 + $0x18] sm:$0xff]   ;;  %v1098_v18 = vld [vmem:[#allocation5 + $0x20] sm:$0xff]   ;;  %v1101_v21 = vld [vmem:[#allocation5 + $0xe8] sm:$0xff]   ;;  %p1240_p7 = por %p1239_p6, %p1238_p5 }
  0x50   :  { %942 = vmatpush3.bf16.msra.mxu0 %v1086_v6  ;;  %v1095_v15 = vld [vmem:[#allocation5 + $0x98] sm:$0xff]   ;;  %v1099_v19 = vld [vmem:[#allocation5 + $0xa0] sm:$0xff]   ;;  %v1102_v22 = vld [vmem:[#allocation5 + $0x28] sm:$0xff]  }
  0x51   :  { %964 = vmatpush3.bf16.msra.mxu1 %v1087_v7  ;;  %943 = vmatprep.subr.bf16.mxu0 %v1088_v8  ;;  %v1103_v23 = vld [vmem:[#allocation5 + $0xa8] sm:$0xff]   ;;  %v1104_v24 = vld [vmem:[#allocation5 + $0x70] sm:$0xff]   ;;  %v1108_v28 = vld [vmem:[#allocation5 + $0x78] sm:$0xff]   ;;  %p1241_p8 = pnand %p1240_p7, %p1234_p4 }
  0x52   :  { %965 = vmatprep.subr.bf16.mxu1 %v1089_v9  ;;  %v1105_v25 = vld [vmem:[#allocation5 + $0xf0] sm:$0xff]   ;;  %v1109_v29 = vld [vmem:[#allocation5 + $0xf8] sm:$0xff]   ;;  %v75_v33 = vld [vmem:[#allocation2 + $0x18] sm:$0xff] }
  0x53   :  { %v1106_v26 = vld [vmem:[#allocation5 + $0x30] sm:$0xff]   ;;  %v1110_v30 = vld [vmem:[#allocation5 + $0x38] sm:$0xff]   ;;  %v72_v34 = vld [vmem:[#allocation2] sm:$0xff]  ;;  %v82_v36 = vpack.c.bf16 %v75_v33, %v75_v33 }
  0x54   :  { %944 = vmatpush3.bf16.msra.mxu0 %v1090_v10  ;;  %v1107_v27 = vld [vmem:[#allocation5 + $0xb0] sm:$0xff]   ;;  %v1111_v31 = vld [vmem:[#allocation5 + $0xb8] sm:$0xff]   ;;  %v79_v37 = vpack.c.bf16 %v72_v34, %v72_v34  ;;  %v1112_v40 = vld [vmem:[#allocation5 + $0x140] sm:$0xff]  }
  0x55   :  { %966 = vmatpush3.bf16.msra.mxu1 %v1091_v11  ;;  %945 = vmatprep.subr.bf16.mxu0 %v1092_v12  ;;  %v73_v32 = vld [vmem:[#allocation2 + $0x8] sm:$0xff]  ;;  %v74_v38 = vld [vmem:[#allocation2 + $0x10] sm:$0xff]  ;;  %v1113_v42 = vld [vmem:[#allocation5 + $0x100] sm:$0xff]  }
  0x56   :  { %967 = vmatprep.subr.bf16.mxu1 %v1093_v13  ;;  %v80_v35 = vpack.c.bf16 %v73_v32, %v73_v32  ;;  %v81_v39 = vpack.c.bf16 %v74_v38, %v74_v38  ;;  %554 = vmatprep.mubr.bf16.mxu1 %v82_v36  ;;  %v1114_v43 = vld [vmem:[#allocation5 + $0x148] sm:$0xff]   ;;  %v1116_v45 = vld [vmem:[#allocation5 + $0x150] sm:$0xff]   ;;  %v1118_v47 = vld [vmem:[#allocation5 + $0x158] sm:$0xff]  }
  0x57   :  { %v1115_v44 = vld [vmem:[#allocation5 + $0x108] sm:$0xff]   ;;  %v1117_v46 = vld [vmem:[#allocation5 + $0x110] sm:$0xff]   ;;  %v1119_v48 = vld [vmem:[#allocation5 + $0x118] sm:$0xff]  }
  0x58   :  { %946 = vmatpush3.bf16.msra.mxu0 %v1094_v14  ;;  %514 = vmatprep.mubr.bf16.mxu0 %v80_v35  ;;  %v1120_v49 = vld [vmem:[#allocation5 + $0x160] sm:$0xff]   ;;  %v1122_v51 = vld [vmem:[#allocation5 + $0x168] sm:$0xff]   ;;  %v77_v53 = vld [vmem:[#allocation2 + $0x28] sm:$0xff] }
  0x59   :  { %968 = vmatpush3.bf16.msra.mxu1 %v1095_v15  ;;  %947 = vmatprep.subr.bf16.mxu0 %v1096_v16  ;;  %v1121_v50 = vld [vmem:[#allocation5 + $0x120] sm:$0xff]   ;;  %v84_v54 = vpack.c.bf16 %v77_v53, %v77_v53  ;;  %v78_v55 = vld [vmem:[#allocation2 + $0x30] sm:$0xff]  ;;  %v1123_v56 = vld [vmem:[#allocation5 + $0x128] sm:$0xff]  }
  0x5a   :  { %969 = vmatprep.subr.bf16.mxu1 %v1097_v17  ;;  %v1128_v52 = vld [vmem:[#allocation5 + $0x180] sm:$0xff]   ;;  %v85_v57 = vpack.c.bf16 %v78_v55, %v78_v55  ;;  %v1124_v58 = vld [vmem:[#allocation5 + $0x170] sm:$0xff]   ;;  %v1126_v60 = vld [vmem:[#allocation5 + $0x178] sm:$0xff]  }
  0x5b   :  { %v1125_v59 = vld [vmem:[#allocation5 + $0x130] sm:$0xff]   ;;  %v1127_v61 = vld [vmem:[#allocation5 + $0x138] sm:$0xff]   ;;  %v76_v62 = vld [vmem:[#allocation2 + $0x20] sm:$0xff] }
  0x5c   :  { %948 = vmatpush3.bf16.msra.mxu0 %v1098_v18  ;;  %v83_v63 = vpack.c.bf16 %v76_v62, %v76_v62  ;;  %v1129_v0 = vld [vmem:[#allocation7] sm:$0xff]   ;;  %v1130_v1 = vld [vmem:[#allocation7 + $0x8] sm:$0xff]   ;;  %v1131_v2 = vld [vmem:[#allocation7 + $0x10] sm:$0xff]  }
  0x5d   :  { %970 = vmatpush3.bf16.msra.mxu1 %v1099_v19  ;;  %949 = vmatprep.subr.bf16.mxu0 %v1100_v20  ;;  %v1132_v3 = vld [vmem:[#allocation7 + $0x18] sm:$0xff]   ;;  %v1133_v4 = vld [vmem:[#allocation7 + $0x20] sm:$0xff]   ;;  %v1134_v5 = vld [vmem:[#allocation7 + $0x28] sm:$0xff]  }
  0x5e   :  { %971 = vmatprep.subr.bf16.mxu1 %v1101_v21  ;;  %v1135_v6 = vld [vmem:[#allocation7 + $0x30] sm:$0xff]   ;;  %v1136_v7 = vld [vmem:[#allocation7 + $0x38] sm:$0xff]   ;;  %v1137_v8 = vld [vmem:[#allocation8] sm:$0xff]  }
  0x5f   :  { %v1138_v9 = vld [vmem:[#allocation8 + $0x8] sm:$0xff]   ;;  %v1139_v10 = vld [vmem:[#allocation8 + $0x10] sm:$0xff]   ;;  %v1140_v11 = vld [vmem:[#allocation8 + $0x18] sm:$0xff]  }
  0x60   :  { %950 = vmatpush3.bf16.msra.mxu0 %v1102_v22  ;;  %v1141_v12 = vld [vmem:[#allocation8 + $0x20] sm:$0xff]   ;;  %v1142_v13 = vld [vmem:[#allocation8 + $0x28] sm:$0xff]   ;;  %v1143_v14 = vld [vmem:[#allocation8 + $0x30] sm:$0xff]  }
  0x61   :  { %972 = vmatpush3.bf16.msra.mxu1 %v1103_v23  ;;  %951 = vmatprep.subr.bf16.mxu0 %v1104_v24 }
  0x62   :  { %973 = vmatprep.subr.bf16.mxu1 %v1105_v25 }
  0x64   :  { %952 = vmatpush3.bf16.msra.mxu0 %v1106_v26 }
  0x65   :  { %974 = vmatpush3.bf16.msra.mxu1 %v1107_v27  ;;  %953 = vmatprep.subr.bf16.mxu0 %v1108_v28 }
  0x66   :  { %975 = vmatprep.subr.bf16.mxu1 %v1109_v29 }
  0x68   :  { %954 = vmatpush3.bf16.msra.mxu0 %v1110_v30 }
  0x69   :  { %976 = vmatpush3.bf16.msra.mxu1 %v1111_v31  ;;  %983 = vmatprep.subr.bf16.mxu0 %v1112_v40 }
  0x6a   :  { %1025 = vmatprep.subr.bf16.mxu1 %v1269_v41 }
  0x6b   :  { %515 = vmatmul.mubr.bf16.vlgmr.msra.gmra.mrb[0].mxu0 %v79_v37 }
  0x6c   :  { %555 = vmatmul.mubr.bf16.vlgmr.msra.gmra.mrb[0].mxu1 %v81_v39  ;;  %984 = vmatpush3.bf16.msra.mxu0 %v1113_v42  ;;  %v1144_v39 = vld [vmem:[#allocation8 + $0x38] sm:$0xff]  }
  0x6d   :  { %1027 = vmatprep.mubr.msk.bf16.mxu1 %vm1270_vm0, %v1269_v41  ;;  %985 = vmatprep.subr.bf16.mxu0 %v1114_v43 }
  0x6e   :  { %1026 = vmatpush3.bf16.msra.mxu1 %v1128_v52  ;;  %594 = vmatprep.mubr.bf16.mxu0 %v84_v54 }
  0x6f   :  { %1031 = vmatprep.subr.bf16.mxu1 %v1269_v41 }
  0x70   :  { %986 = vmatpush3.bf16.msra.mxu0 %v1115_v44 }
  0x71   :  { %987 = vmatprep.subr.bf16.mxu0 %v1116_v45 }
  0x74   :  { %988 = vmatpush3.bf16.msra.mxu0 %v1117_v46  ;;  %1028 = vmatmul.mubr.msk.bf16.vlgmr.msra.gmra.mrb[4].mxu1 %vm478_vm1, %v85_v57 }
  0x75   :  { %989 = vmatprep.subr.bf16.mxu0 %v1118_v47  ;;  %1047 = vmatprep.mubr.msk.bf16.mxu1 %vm1270_vm0, %v1269_v41 }
  0x76   :  { %1032 = vmatpush3.bf16.msra.mxu1 %v1129_v0 }
  0x77   :  { %1033 = vmatprep.subr.bf16.mxu1 %v1269_v41 }
  0x78   :  { %990 = vmatpush3.bf16.msra.mxu0 %v1119_v48 }
  0x79   :  { %991 = vmatprep.subr.bf16.mxu0 %v1120_v49 }
  0x7a   :  { %1034 = vmatpush3.bf16.msra.mxu1 %v1130_v1 }
  0x7b   :  { %1035 = vmatprep.subr.bf16.mxu1 %v1269_v41 }
  0x7c   :  { %992 = vmatpush3.bf16.msra.mxu0 %v1121_v50 }
  0x7d   :  { %993 = vmatprep.subr.bf16.mxu0 %v1122_v51 }
  0x7e   :  { %1036 = vmatpush3.bf16.msra.mxu1 %v1131_v2 }
  0x7f   :  { %1037 = vmatprep.subr.bf16.mxu1 %v1269_v41 }
  0x80   :  { %994 = vmatpush3.bf16.msra.mxu0 %v1123_v56 }
  0x81   :  { %995 = vmatprep.subr.bf16.mxu0 %v1124_v58 }
  0x82   :  { %1038 = vmatpush3.bf16.msra.mxu1 %v1132_v3 }
  0x83   :  { %1039 = vmatprep.subr.bf16.mxu1 %v1269_v41 }
  0x84   :  { %996 = vmatpush3.bf16.msra.mxu0 %v1125_v59 }
  0x85   :  { %997 = vmatprep.subr.bf16.mxu0 %v1126_v60 }
  0x86   :  { %1040 = vmatpush3.bf16.msra.mxu1 %v1133_v4 }
  0x87   :  { %1041 = vmatprep.subr.bf16.mxu1 %v1269_v41 }
  0x88   :  { %998 = vmatpush3.bf16.msra.mxu0 %v1127_v61 }
  0x89   :  { %1051 = vmatprep.subr.bf16.mxu0 %v1269_v41 }
  0x8a   :  { %1042 = vmatpush3.bf16.msra.mxu1 %v1134_v5 }
  0x8b   :  { %595 = vmatmul.mubr.bf16.vlgmr.msra.gmra.mrb[4].mxu0 %v83_v63  ;;  %1043 = vmatprep.subr.bf16.mxu1 %v1269_v41 }
  0x8c   :  { %1067 = vmatprep.mubr.msk.bf16.mxu0 %vm1270_vm0, %v1269_v41  ;;  %1052 = vmatpush3.bf16.msra.mxu0 %v1137_v8 }
  0x8d   :  { %1053 = vmatprep.subr.bf16.mxu0 %v1269_v41 }
  0x8e   :  { %1044 = vmatpush3.bf16.msra.mxu1 %v1135_v6 }
  0x8f   :  { %1045 = vmatprep.subr.bf16.mxu1 %v1269_v41 }
  0x90   :  { %1054 = vmatpush3.bf16.msra.mxu0 %v1138_v9 }
  0x91   :  { %1055 = vmatprep.subr.bf16.mxu0 %v1269_v41 }
  0x92   :  { %1046 = vmatpush3.bf16.msra.mxu1 %v1136_v7 }
  0x94   :  { %1056 = vmatpush3.bf16.msra.mxu0 %v1139_v10 }
  0x95   :  { %1057 = vmatprep.subr.bf16.mxu0 %v1269_v41 }
  0x98   :  { %1058 = vmatpush3.bf16.msra.mxu0 %v1140_v11 }
  0x99   :  { %1059 = vmatprep.subr.bf16.mxu0 %v1269_v41 }
  0x9c   :  { %1060 = vmatpush3.bf16.msra.mxu0 %v1141_v12 }
  0x9d   :  { %1061 = vmatprep.subr.bf16.mxu0 %v1269_v41 }
  0xa0   :  { %1062 = vmatpush3.bf16.msra.mxu0 %v1142_v13 }
  0xa1   :  { %1063 = vmatprep.subr.bf16.mxu0 %v1269_v41 }
  0xa4   :  { %1064 = vmatpush3.bf16.msra.mxu0 %v1143_v14 }
  0xa5   :  { %1065 = vmatprep.subr.bf16.mxu0 %v1269_v41 }
  0xa8   :  { %1066 = vmatpush3.bf16.msra.mxu0 %v1144_v39 }
 0x13e   :  { %v955_v15 = vpop.f32.mrb[0].mxu0 }
 0x13f   :  { %v977_v16 = vpop.f32.mrb[0].mxu1  ;;  %v956_v17 = vpop.f32.mrb[1].mxu0 }
 0x140   :  { %v978_v18 = vpop.f32.mrb[1].mxu1  ;;  %v957_v19 = vadd.f32 %v956_v17, %v955_v15  ;;  %v958_v21 = vpop.f32.mrb[2].mxu0 }
 0x141   :  { %v979_v20 = vadd.f32 %v978_v18, %v977_v16  ;;  %v980_v22 = vpop.f32.mrb[2].mxu1  ;;  %v959_v23 = vpop.f32.mrb[3].mxu0 }
 0x142   :  { %v981_v24 = vpop.f32.mrb[3].mxu1 }
 0x143   :  { %v557_v25 = vadd.f32 %v979_v20, %v957_v19 }
 0x147   :  { %v636_v26 = vpop.f32.mrb[4].mxu1 }
 0x148   :  { %v1029_v27 = vpop.f32.mrb[5].mxu1 }
 0x149   :  { %v639_v28 = vpop.f32.mrb[6].mxu1 }
 0x14a   :  { %v1030_v29 = vpop.f32.mrb[7].mxu1 }
 0x15e   :  { %v999_v30 = vpop.f32.mrb[4].mxu0 }
 0x15f   :  { %v1000_v31 = vpop.f32.mrb[5].mxu0 }
 0x160   :  { %v1001_v32 = vadd.f32 %v1000_v31, %v999_v30  ;;  %v1002_v33 = vpop.f32.mrb[6].mxu0 }
 0x161   :  { %v1003_v34 = vpop.f32.mrb[7].mxu0 }
 0x162   :  { %v597_v35 = vadd.f32 %v1001_v32, %v557_v25 }
 0x164   :  { %v637_v36 = vadd.f32 %v636_v26, %v597_v35 }
 0x166   :  { %v642_v37 = vmax.f32 %v637_v36, 0.0 }
 0x168   :  { %v643_v38 = vpack.c.bf16 %v642_v37, %v642_v37 }
 0x16a   :  { %1048 = vmatmul.mubr.bf16.vlgmr.msra.gmra.mrb[8].mxu1 %v643_v38 }
 0x23d   :  { %v742_v40 = vpop.f32.mrb[8].mxu1 }
 0x23e   :  { %v748_v41 = vmax.f32 %v742_v40, 0.0  ;;  %v1049_v42 = vpop.f32.mrb[9].mxu1 }
 0x23f   :  { %v745_v43 = vpop.f32.mrb[10].mxu1 }
 0x240   :  { %v749_v44 = vpack.c.bf16 %v748_v41, %v748_v41  ;;  %v1050_v45 = vpop.f32.mrb[11].mxu1 }
 0x242   :  { %1068 = vmatmul.mubr.bf16.vlgmr.msra.gmra.mrb[8].mxu0 %v749_v44 }
 0x315   :  { %v848_v46 = vpop.f32.mrb[8].mxu0 }
 0x316   :  { %v854_v47 = vpack.c.bf16 %v848_v46, %v848_v46  ;;  %v1069_v48 = vpop.f32.mrb[9].mxu0 }
 0x317   :  { %v851_v49 = vpop.f32.mrb[10].mxu0 }
 0x318   :  { %855 = vst [vmem:[#allocation10] sm:$0xf] %v854_v47  ;;  %v1070_v50 = vpop.f32.mrb[11].mxu0 }
 0x319   :  { %1244 = shalt.err (!%p1241_p8)
}
 0x31a   :  { %s1245_s1 = scalar_lea.hbm %s1393_s4, 64 }
 0x31b   :  { %p1246_p9 = scmp.ne.s32.totalorder %s1393_s4, %s1245_s1  ;;  %p1249_p10 = scmp.lt.u32.totalorder %s1245_s1, %s1393_s4 }
 0x31d   :  { %p1251_p11 = pnand %p1249_p10, %p1246_p9 }
 0x31f   :  { %1254 = shalt.err (!%p1251_p11)
}
 0x320   :  { %865 = dma.vmem_to_hbm [thread:$0]  %s863_s25, 64, %s1393_s4, [#allocation4]  }
 0x321   :  { %1261 = dma.done.wait [#allocation4], 64  }
 0x322   :  { %1262 = vsyncadd [#allocation4], 4294967232 }
 0x323   :  { %869 = vsyncpa [#allocation3], 1 }
 0x324   :  { %870 = vsyncpa [#allocation6], 1 }
 0x325   :  { %871 = vsyncpa [#allocation9], 1 }
 0x326   :  { %872 = vsyncpa [#allocation4], 1 }

</bundles_post_ra>
